<compile_context>
chip_gen: v7x
topology: tpu7x:2x2x1
jax: 0.10.0
libtpu: 0.0.40
codegen_flags: <defaults>
</compile_context>

<pallas_src>
import jax
import jax.numpy as jnp
from jax.experimental import pallas as pl
from jax.experimental.pallas import tpu as pltpu


def _sinusoid_pe_kernel(x_ref, w_ref, phase_ref, o_ref):
    # MXU matmul with f32 accumulation, then VPU add (phase) + sin.
    proj = jnp.dot(x_ref[...], w_ref[...], preferred_element_type=jnp.float32)
    o_ref[...] = jnp.sin(proj + phase_ref[...]).astype(o_ref.dtype)


def _round_up(a, b):
    return ((a + b - 1) // b) * b


def _choose_pack(num, in_dim, out_dim):
    """Largest pack with num % pack == 0, (pack*out_dim) % 128 == 0, pack*in_dim <= 128."""
    if in_dim > 128:
        return 1
    for p in range(max(1, 128 // in_dim), 1, -1):
        if num % p == 0 and (p * out_dim) % 128 == 0:
            return p
    return 1


def make_sinusoid_pe(w, num, *, tm=4096, out_dtype=jnp.float32):
    """Build a jitted forward for fixed weight `w` (in_dim, s_dim) and `num` positions.

    Returned fn: x (num, in_dim) -> (1, num, 2*s_dim) out_dtype, equal to
    interleave(sin(x @ w), cos(x @ w))[None, ...].
    All weight preparation happens once here (hoisted out of the per-call path).
    """
    in_dim, s_dim = w.shape
    out_dim = 2 * s_dim

    # interleave(sin(xW), cos(xW)) == sin(x @ Wd + phase),
    #   Wd[:, 2j] = Wd[:, 2j+1] = W[:, j];  phase = [0, pi/2, 0, pi/2, ...]
    wd = jnp.repeat(w.astype(jnp.float32), 2, axis=1)                    # (in_dim, out_dim)
    phase = jnp.tile(jnp.asarray([0.0, jnp.pi / 2.0], jnp.float32), s_dim)

    pack = _choose_pack(num, in_dim, out_dim)
    rows = num // pack
    in_eff = pack * in_dim
    out_eff = pack * out_dim

    if pack > 1:
        # Block-diagonal weight folds `pack` consecutive positions into one lane-dense row.
        w_eff = jax.scipy.linalg.block_diag(*([wd] * pack))              # (in_eff, out_eff)
        phase_eff = jnp.tile(phase, pack)[None, :]
        out_pad = out_eff
    else:
        # Fallback: zero-pad output columns to a multiple of 128 (unmasked vst);
        # padded columns are sliced off outside the kernel.
        out_pad = _round_up(out_eff, 128)
        w_eff = jnp.pad(wd, ((0, 0), (0, out_pad - out_eff)))
        phase_eff = jnp.pad(phase, (0, out_pad - out_eff))[None, :]

    out_itemsize = jnp.dtype(out_dtype).itemsize
    sub = 8 if out_itemsize >= 4 else (16 if out_itemsize == 2 else 32)

    # Row tiling: large tiles, but capped so the grid has >= 2 steps whenever rows
    # allow (so v7x's two TensorCores both get work via "parallel").
    tm = max(sub, (int(tm) // sub) * sub)
    tm_cap = _round_up(pl.cdiv(rows, 2), sub)
    tm_eff = min(tm, tm_cap)
    if tm_eff >= rows:
        tm_eff = rows

    # Keep the double-buffered working set under a budget safe on all generations
    # (v7x: 64 MiB physical VMEM), and tell Mosaic the scoped limit we need.
    fixed_bytes = 2 * (w_eff.size * 4 + phase_eff.size * 4)
    per_row_bytes = 2 * (in_eff * 4 + out_pad * out_itemsize)            # x + out, 2 buffers
    budget = 48 << 20
    while tm_eff > sub and tm_eff * per_row_bytes + fixed_bytes > budget:
        tm_eff = max(sub, ((tm_eff // 2) // sub) * sub)
    grid = (pl.cdiv(rows, tm_eff),)
    vmem_limit = int(min(budget, max(32 << 20,
                                     tm_eff * per_row_bytes + fixed_bytes + (4 << 20))))

    cost = pl.CostEstimate(
        flops=2 * rows * in_eff * out_pad,
        transcendentals=rows * out_pad,
        bytes_accessed=4 * (rows * in_eff + in_eff * out_pad + out_pad)
        + out_itemsize * rows * out_pad,
    )

    call = pl.pallas_call(
        _sinusoid_pe_kernel,
        out_shape=jax.ShapeDtypeStruct((rows, out_pad), out_dtype),
        grid=grid,
        in_specs=[
            pl.BlockSpec((tm_eff, in_eff), lambda i: (i, 0)),    # x tile (pipelined)
            pl.BlockSpec((in_eff, out_pad), lambda i: (0, 0)),   # weight (resident)
            pl.BlockSpec((1, out_pad), lambda i: (0, 0)),        # phase row (resident)
        ],
        out_specs=pl.BlockSpec((tm_eff, out_pad), lambda i: (i, 0)),
        compiler_params=pltpu.CompilerParams(
            dimension_semantics=("parallel",),
            vmem_limit_bytes=vmem_limit,
        ),
        cost_estimate=cost,
    )

    @jax.jit
    def forward(x):
        assert x.shape == (num, in_dim), x.shape
        x_eff = x.astype(jnp.float32).reshape(rows, in_eff)       # layout-preserving
        out = call(x_eff, w_eff, phase_eff)
        # Un-pack (layout-preserving reshape) and drop any lane padding, then unsqueeze(0).
        out = out.reshape(num, out_pad // pack)[:, :out_dim]
        return out[None]

    return forward


def learnable_sinusoid_pe(x, w, *, tm=4096, out_dtype=jnp.float32):
    """Convenience one-shot wrapper (prefer make_sinusoid_pe for repeated calls)."""
    return make_sinusoid_pe(w, x.shape[0], tm=tm, out_dtype=out_dtype)(x)


def reference(x, w):
    proj = x.astype(jnp.float32) @ w.astype(jnp.float32)
    out = jnp.stack([jnp.sin(proj), jnp.cos(proj)], axis=-1).reshape(proj.shape[0], -1)
    return out[None]


if __name__ == "__main__":
    # Small shapes consistent with the module: in_dim=16, s_dim=32, num=8 positions.
    in_dim, s_dim, num = 16, 32, 8

    key = jax.random.PRNGKey(0)
    kx, kw = jax.random.split(key)
    x = jax.random.normal(kx, (num, in_dim), dtype=jnp.float32)
    # TODO(synk): deterministic synthetic parameter replacing
    # torch.load('./models/pretrain_pos/wr_256.pt').t() (no file I/O allowed).
    w = jax.random.normal(kw, (in_dim, s_dim), dtype=jnp.float32) * 0.1

    pe = make_sinusoid_pe(w, num)          # weight prep hoisted (once per weight)
    out = jax.block_until_ready(pe(x))
    ref = reference(x, w)
    assert out.shape == (1, num, 2 * s_dim), out.shape
    assert jnp.allclose(out, ref, atol=1e-5, rtol=1e-5), "mismatch vs reference"

    # Larger num exercises the multi-step grid (>= 2 steps so v7x's 2 TCs both work).
    num_big = 4096
    xb = jax.random.normal(jax.random.PRNGKey(1), (num_big, in_dim), dtype=jnp.float32)
    pe_big = make_sinusoid_pe(w, num_big)
    out_big = jax.block_until_ready(pe_big(xb))
    assert out_big.shape == (1, num_big, 2 * s_dim)
    assert jnp.allclose(out_big, reference(xb, w), atol=1e-5, rtol=1e-5)

    # bf16 output path (halves writeback traffic; most valuable on v5e).
    out_bf16 = jax.block_until_ready(
        make_sinusoid_pe(w, num_big, out_dtype=jnp.bfloat16)(xb))
    assert out_bf16.dtype == jnp.bfloat16
    assert jnp.allclose(out_bf16.astype(jnp.float32), reference(xb, w),
                        atol=2e-2, rtol=2e-2)

    # Ragged out_dim / ragged num exercise the pack=1 + lane-padding fallback
    # with a partial final grid block.
    s_dim_r, num_r = 20, 50
    wr = jax.random.normal(jax.random.PRNGKey(2), (in_dim, s_dim_r), jnp.float32) * 0.1
    xr = jax.random.normal(jax.random.PRNGKey(3), (num_r, in_dim), jnp.float32)
    out_r = jax.block_until_ready(learnable_sinusoid_pe(xr, wr))
    assert out_r.shape == (1, num_r, 2 * s_dim_r)
    assert jnp.allclose(out_r, reference(xr, wr), atol=1e-5, rtol=1e-5)

    print("KERNEL_OK")
</pallas_src>

<mosaic_0001>
module attributes {stable_mosaic.version = 11 : i64} {
  func.func @_sinusoid_pe_kernel(%arg0: i32, %arg1: memref<1x128xf32, #tpu.memory_space<vmem>>, %arg2: memref<128x512xf32, #tpu.memory_space<vmem>>, %arg3: memref<1x512xf32, #tpu.memory_space<vmem>>, %arg4: memref<1x512xf32, #tpu.memory_space<vmem>>) attributes {dimension_semantics = [#tpu.dimension_semantics<parallel>], iteration_bounds = array<i64: 1>, scalar_prefetch = 0 : i64, scratch_operands = 0 : i64, tpu.core_type = #tpu.core_type<tc>, window_params = [{transform_indices = @transform_0, window_bounds = array<i64: 1, 128>}, {pipeline_mode = #tpu.pipeline_mode<synchronous>, transform_indices = @transform_1, window_bounds = array<i64: 128, 512>}, {pipeline_mode = #tpu.pipeline_mode<synchronous>, transform_indices = @transform_2, window_bounds = array<i64: 1, 512>}, {transform_indices = @transform_3, window_bounds = array<i64: 1, 512>}]} {
    %c0 = arith.constant 0 : index
    %c0_0 = arith.constant 0 : index
    %0 = vector.load %arg1[%c0, %c0_0] : memref<1x128xf32, #tpu.memory_space<vmem>>, vector<1x128xf32>
    %c0_1 = arith.constant 0 : index
    %c0_2 = arith.constant 0 : index
    %1 = vector.load %arg2[%c0_1, %c0_2] : memref<128x512xf32, #tpu.memory_space<vmem>>, vector<128x512xf32>
    %cst = arith.constant dense<0.000000e+00> : vector<1x512xf32>
    %2 = tpu.matmul %0, %1, %cst {dimension_numbers = #tpu.dot_dimension_numbers<[1], [0], [0], [1], [0, 0, 1, 1], [], []>} : vector<1x128xf32>, vector<128x512xf32>, vector<1x512xf32> -> vector<1x512xf32>
    %c0_3 = arith.constant 0 : index
    %c0_4 = arith.constant 0 : index
    %3 = vector.load %arg3[%c0_3, %c0_4] : memref<1x512xf32, #tpu.memory_space<vmem>>, vector<1x512xf32>
    %4 = arith.addf %2, %3 : vector<1x512xf32>
    %5 = math.sin %4 : vector<1x512xf32>
    %c0_5 = arith.constant 0 : index
    %c0_6 = arith.constant 0 : index
    %6 = vector.load %arg4[%c0_5, %c0_6] : memref<1x512xf32, #tpu.memory_space<vmem>>, vector<1x512xf32>
    tpu.vector_store %arg4[%c0_5, %c0_6], %5 {strides = array<i32>} : memref<1x512xf32, #tpu.memory_space<vmem>>, vector<1x512xf32>,
    return
  }
  func.func @transform_0(%arg0: i32) -> (i32, i32) {
    %c0_i32 = arith.constant 0 : i32
    %c0_i32_0 = arith.constant 0 : i32
    return %arg0, %c0_i32 : i32, i32
  }
  func.func @transform_1(%arg0: i32) -> (i32, i32) {
    %c0_i32 = arith.constant 0 : i32
    %c0_i32_0 = arith.constant 0 : i32
    %c0_i32_1 = arith.constant 0 : i32
    return %c0_i32, %c0_i32_0 : i32, i32
  }
  func.func @transform_2(%arg0: i32) -> (i32, i32) {
    %c0_i32 = arith.constant 0 : i32
    %c0_i32_0 = arith.constant 0 : i32
    %c0_i32_1 = arith.constant 0 : i32
    return %c0_i32, %c0_i32_0 : i32, i32
  }
  func.func @transform_3(%arg0: i32) -> (i32, i32) {
    %c0_i32 = arith.constant 0 : i32
    %c0_i32_0 = arith.constant 0 : i32
    return %arg0, %c0_i32 : i32, i32
  }
}

</mosaic_0001>

<bundles_post_ra>
// kernel: forward.1
= control target key start
LH: loop header
LB: loop body
LE: loop exit
PB: predicated region body
PF: predicated region fallthrough
CT: control target
= control target key end

     0   :  { %8 = vsyncpa [#allocation3], 0  ;;  %s859_s12 = smov [#allocation2]   ;;  %s1200_s0 = inlined_call_operand.vmem [shape: f32[1,128], index: 0, kind: input, shape index: {}]   ;;  %s1201_s1 = inlined_call_operand.hbm [shape: f32[128,512], index: 1, kind: input, shape index: {}]   ;;  %s1202_s2 = inlined_call_operand.vmem [shape: f32[1,512], index: 2, kind: input, shape index: {}]   ;;  %s1203_s3 = inlined_call_operand.vmem [shape: f32[1,512], index: 3, kind: output, shape index: {}]  }
   0x1   :  { %s16_s13 = sshll.u32 %s859_s12, 4  ;;  %s835_s16 = scalar_lea.hbm %s1201_s1, 8192  ;;  %s17_s13 = int_to_ptr.vmem [resolvable:$true] %s16_s13 }
   0x2   :  { %p836_p0 = scmp.ne.s32.totalorder %s1201_s1, %s835_s16  ;;  %p839_p1 = scmp.lt.u32.totalorder %s835_s16, %s1201_s1 }
   0x4   :  { %p841_p2 = pnand %p839_p1, %p836_p0 }
   0x6   :  { %844 = shalt.err (!%p841_p2)
}
   0x7   :  { %s845_s21 = scalar_lea.vmem %s17_s13, 8192  ;;  %p850_p4 = scmp.lt.s32.totalorder %s17_s13, %s17_s13 }
   0x8   :  { %p846_p3 = scmp.ne.s32.totalorder %s17_s13, %s845_s21  ;;  %p851_p5 = scmp.lt.s32.totalorder %s845_s21, %s845_s21 }
   0xa   :  { %p852_p6 = por %p851_p5, %p850_p4 }
   0xc   :  { %p853_p7 = pnand %p852_p6, %p846_p3 }
   0xe   :  { %856 = shalt.err (!%p853_p7)
}
   0xf   :  { %s860_s22 = smov 512   ;;  %s861_s23 = smov 32  }
  0x10   :  { %22 = dma.hbm_to_vmem [thread:$0]  %s1201_s1, 8192, %s17_s13, [#allocation3], %s860_s22, %s860_s22, %s861_s23  }
  0x11   :  { %857 = dma.done.wait [#allocation3], 8192  }
  0x12   :  { %858 = vsyncadd [#allocation3], 4294959104  ;;  %v862_v0 = vmov 0.0   ;;  %v30_v1 = vld [vmem:[#allocation2 + $0x8] sm:$0xff]  ;;  %v32_v3 = vld [vmem:[#allocation2 + $0x18] sm:$0xff] }
  0x13   :  { %179 = vmatprep.mubr.f32.mxu0 %v862_v0  ;;  %250 = vmatprep.mubr.f32.mxu1 %v862_v0  ;;  %v34_v2 = vld [vmem:[#allocation2 + $0x28] sm:$0xff]  ;;  %v36_v5 = vld [vmem:[#allocation2 + $0x38] sm:$0xff]  ;;  %v29_v6 = vld [vmem:[#allocation2] sm:$0xff] }
  0x14   :  { %v728_v4 = vpack.c.bf16 %v34_v2, %v30_v1  ;;  %v33_v7 = vld [vmem:[#allocation2 + $0x20] sm:$0xff]  ;;  %v760_v8 = vpack.c.bf16 %v36_v5, %v32_v3  ;;  %v31_v10 = vld [vmem:[#allocation2 + $0x10] sm:$0xff]  ;;  %v38_v12 = vld [vmem:[#allocation2 + $0x48] sm:$0xff] }
  0x15   :  { %v730_v9 = vpack.c.bf16 %v33_v7, %v29_v6  ;;  %v35_v11 = vld [vmem:[#allocation2 + $0x30] sm:$0xff]  ;;  %v42_v14 = vld [vmem:[#allocation2 + $0x68] sm:$0xff]  ;;  %v40_v15 = vld [vmem:[#allocation2 + $0x58] sm:$0xff] }
  0x16   :  { %729 = vmatprep.subr.bf16.mxu0 %v728_v4  ;;  %v762_v13 = vpack.c.bf16 %v35_v11, %v31_v10  ;;  %v44_v16 = vld [vmem:[#allocation2 + $0x78] sm:$0xff]  ;;  %761 = vmatprep.subr.bf16.mxu1 %v760_v8  ;;  %v732_v17 = vpack.c.bf16 %v42_v14, %v38_v12  ;;  %v37_v19 = vld [vmem:[#allocation2 + $0x40] sm:$0xff]  ;;  %v39_v21 = vld [vmem:[#allocation2 + $0x50] sm:$0xff] }
  0x17   :  { %731 = vmatpush1.bf16.msra.mxu0 %v730_v9  ;;  %v764_v18 = vpack.c.bf16 %v44_v16, %v40_v15  ;;  %v41_v20 = vld [vmem:[#allocation2 + $0x60] sm:$0xff]  ;;  %v43_v23 = vld [vmem:[#allocation2 + $0x70] sm:$0xff]  ;;  %v46_v24 = vld [vmem:[#allocation2 + $0x88] sm:$0xff] }
  0x18   :  { %763 = vmatpush1.bf16.msra.mxu1 %v762_v13  ;;  %v734_v22 = vpack.c.bf16 %v41_v20, %v37_v19  ;;  %v50_v25 = vld [vmem:[#allocation2 + $0xa8] sm:$0xff]  ;;  %733 = vmatprep.subr.bf16.mxu0 %v732_v17  ;;  %v766_v26 = vpack.c.bf16 %v43_v23, %v39_v21  ;;  %v48_v28 = vld [vmem:[#allocation2 + $0x98] sm:$0xff]  ;;  %v45_v30 = vld [vmem:[#allocation2 + $0x80] sm:$0xff] }
  0x19   :  { %765 = vmatprep.subr.bf16.mxu1 %v764_v18  ;;  %v736_v27 = vpack.c.bf16 %v50_v25, %v46_v24  ;;  %v52_v29 = vld [vmem:[#allocation2 + $0xb8] sm:$0xff]  ;;  %v49_v32 = vld [vmem:[#allocation2 + $0xa0] sm:$0xff]  ;;  %v47_v33 = vld [vmem:[#allocation2 + $0x90] sm:$0xff] }
  0x1a   :  { %v768_v31 = vpack.c.bf16 %v52_v29, %v48_v28  ;;  %v51_v34 = vld [vmem:[#allocation2 + $0xb0] sm:$0xff]  ;;  %v738_v35 = vpack.c.bf16 %v49_v32, %v45_v30  ;;  %v54_v36 = vld [vmem:[#allocation2 + $0xc8] sm:$0xff]  ;;  %v56_v38 = vld [vmem:[#allocation2 + $0xd8] sm:$0xff] }
  0x1b   :  { %735 = vmatpush1.bf16.msra.mxu0 %v734_v22  ;;  %v58_v37 = vld [vmem:[#allocation2 + $0xe8] sm:$0xff]  ;;  %v770_v39 = vpack.c.bf16 %v51_v34, %v47_v33  ;;  %v60_v41 = vld [vmem:[#allocation2 + $0xf8] sm:$0xff]  ;;  %v53_v42 = vld [vmem:[#allocation2 + $0xc0] sm:$0xff]  ;;  %v95_v34 = vlaneseq }
  0x1c   :  { %767 = vmatpush1.bf16.msra.mxu1 %v766_v26  ;;  %737 = vmatprep.subr.bf16.mxu0 %v736_v27  ;;  %v740_v40 = vpack.c.bf16 %v58_v37, %v54_v36  ;;  %v57_v43 = vld [vmem:[#allocation2 + $0xe0] sm:$0xff]  ;;  %v772_v44 = vpack.c.bf16 %v60_v41, %v56_v38  ;;  %v55_v45 = vld [vmem:[#allocation2 + $0xd0] sm:$0xff]  ;;  %v62_v47 = vld [vmem:[#allocation2 + $0x108] sm:$0xff] }
  0x1d   :  { %769 = vmatprep.subr.bf16.mxu1 %v768_v31  ;;  %v59_v46 = vld [vmem:[#allocation2 + $0xf0] sm:$0xff]  ;;  %v66_v48 = vld [vmem:[#allocation2 + $0x128] sm:$0xff]  ;;  %v64_v49 = vld [vmem:[#allocation2 + $0x118] sm:$0xff]  ;;  %v742_v51 = vpack.c.bf16 %v57_v43, %v53_v42 }
  0x1e   :  { %v68_v50 = vld [vmem:[#allocation2 + $0x138] sm:$0xff]  ;;  %v774_v52 = vpack.c.bf16 %v59_v46, %v55_v45  ;;  %v744_v53 = vpack.c.bf16 %v66_v48, %v62_v47  ;;  %v61_v54 = vld [vmem:[#allocation2 + $0x100] sm:$0xff]  ;;  %v63_v56 = vld [vmem:[#allocation2 + $0x110] sm:$0xff] }
  0x1f   :  { %739 = vmatpush1.bf16.msra.mxu0 %v738_v35  ;;  %v65_v55 = vld [vmem:[#allocation2 + $0x120] sm:$0xff]  ;;  %v776_v57 = vpack.c.bf16 %v68_v50, %v64_v49  ;;  %v67_v58 = vld [vmem:[#allocation2 + $0x130] sm:$0xff]  ;;  %v70_v59 = vld [vmem:[#allocation2 + $0x148] sm:$0xff]  ;;  %v906_v35 = vshrl.u32 %v95_v34, 7 }
  0x20   :  { %771 = vmatpush1.bf16.msra.mxu1 %v770_v39  ;;  %741 = vmatprep.subr.bf16.mxu0 %v740_v40  ;;  %v74_v60 = vld [vmem:[#allocation2 + $0x168] sm:$0xff]  ;;  %v72_v61 = vld [vmem:[#allocation2 + $0x158] sm:$0xff]  ;;  %v746_v63 = vpack.c.bf16 %v65_v55, %v61_v54  ;;  %v778_v0 = vpack.c.bf16 %v67_v58, %v63_v56  ;;  %v69_v2 = vld [vmem:[#allocation2 + $0x140] sm:$0xff] }
  0x21   :  { %773 = vmatprep.subr.bf16.mxu1 %v772_v44  ;;  %v76_v62 = vld [vmem:[#allocation2 + $0x178] sm:$0xff]  ;;  %v748_v1 = vpack.c.bf16 %v74_v60, %v70_v59  ;;  %v73_v3 = vld [vmem:[#allocation2 + $0x160] sm:$0xff]  ;;  %v71_v4 = vld [vmem:[#allocation2 + $0x150] sm:$0xff]  ;;  %v97_v36 = vsub.s32 0, %v906_v35  ;;  %v105_v38 = vsub.s32 2, %v906_v35  ;;  %v101_v39 = vsub.s32 1, %v906_v35 }
  0x22   :  { %v780_v5 = vpack.c.bf16 %v76_v62, %v72_v61  ;;  %v75_v6 = vld [vmem:[#allocation2 + $0x170] sm:$0xff]  ;;  %v78_v7 = vld [vmem:[#allocation2 + $0x188] sm:$0xff]  ;;  %v80_v9 = vld [vmem:[#allocation2 + $0x198] sm:$0xff]  ;;  %v750_v11 = vpack.c.bf16 %v73_v3, %v69_v2 }
  0x23   :  { %743 = vmatpush1.bf16.msra.mxu0 %v742_v51  ;;  %v82_v8 = vld [vmem:[#allocation2 + $0x1a8] sm:$0xff]  ;;  %v84_v10 = vld [vmem:[#allocation2 + $0x1b8] sm:$0xff]  ;;  %v782_v12 = vpack.c.bf16 %v75_v6, %v71_v4  ;;  %v77_v14 = vld [vmem:[#allocation2 + $0x180] sm:$0xff] }
  0x24   :  { %775 = vmatpush1.bf16.msra.mxu1 %v774_v52  ;;  %745 = vmatprep.subr.bf16.mxu0 %v744_v53  ;;  %v752_v13 = vpack.c.bf16 %v82_v8, %v78_v7  ;;  %v81_v15 = vld [vmem:[#allocation2 + $0x1a0] sm:$0xff]  ;;  %v79_v16 = vld [vmem:[#allocation2 + $0x190] sm:$0xff]  ;;  %v784_v17 = vpack.c.bf16 %v84_v10, %v80_v9  ;;  %v86_v19 = vld [vmem:[#allocation2 + $0x1c8] sm:$0xff] }
  0x25   :  { %777 = vmatprep.subr.bf16.mxu1 %v776_v57  ;;  %v83_v18 = vld [vmem:[#allocation2 + $0x1b0] sm:$0xff]  ;;  %v90_v20 = vld [vmem:[#allocation2 + $0x1e8] sm:$0xff]  ;;  %v88_v21 = vld [vmem:[#allocation2 + $0x1d8] sm:$0xff]  ;;  %v754_v23 = vpack.c.bf16 %v81_v15, %v77_v14  ;;  %v863_v14 = vmov 683565275  }
  0x26   :  { %v92_v22 = vld [vmem:[#allocation2 + $0x1f8] sm:$0xff]  ;;  %v786_v24 = vpack.c.bf16 %v83_v18, %v79_v16  ;;  %v756_v25 = vpack.c.bf16 %v90_v20, %v86_v19  ;;  %v85_v26 = vld [vmem:[#allocation2 + $0x1c0] sm:$0xff]  ;;  %v87_v29 = vld [vmem:[#allocation2 + $0x1d0] sm:$0xff]  ;;  %v864_v18 = vmov 2475754826  }
  0x27   :  { %747 = vmatpush1.bf16.msra.mxu0 %v746_v63  ;;  %v89_v27 = vld [vmem:[#allocation2 + $0x1e0] sm:$0xff]  ;;  %v788_v28 = vpack.c.bf16 %v92_v22, %v88_v21  ;;  %v91_v30 = vld [vmem:[#allocation2 + $0x1f0] sm:$0xff]  ;;  %v109_v63 = vsub.s32 3, %v906_v35  ;;  %v865_v20 = vmov 2131351028  }
  0x28   :  { %779 = vmatpush1.bf16.msra.mxu1 %v778_v0  ;;  %749 = vmatprep.subr.bf16.mxu0 %v748_v1  ;;  %v758_v31 = vpack.c.bf16 %v89_v27, %v85_v26  ;;  %v790_v32 = vpack.c.bf16 %v91_v30, %v87_v29  ;;  %v28_v33 = vld [vmem:[%s1200_s0] sm:$0x1]  ;;  %v866_v22 = vmov 2102212464  }
  0x29   :  { %781 = vmatprep.subr.bf16.mxu1 %v780_v5  ;;  %v93_v37 = vld [vmem:[%s1202_s2] sm:$0xf] }
  0x2a   :  { %v98_v40 = vrot.slane %v93_v37, %v97_v36  ;;  %v106_v41 = vrot.slane %v93_v37, %v105_v38  ;;  %v102_v42 = vrot.slane %v93_v37, %v101_v39  ;;  %v932_v8 = vrot.slane %v93_v37, %v109_v63 }
  0x2b   :  { %751 = vmatpush1.bf16.msra.mxu0 %v750_v11 }
  0x2c   :  { %783 = vmatpush1.bf16.msra.mxu1 %v782_v12  ;;  %753 = vmatprep.subr.bf16.mxu0 %v752_v13 }
  0x2d   :  { %785 = vmatprep.subr.bf16.mxu1 %v784_v17 }
  0x2f   :  { %755 = vmatpush1.bf16.msra.mxu0 %v754_v23 }
  0x30   :  { %787 = vmatpush1.bf16.msra.mxu1 %v786_v24  ;;  %757 = vmatprep.subr.bf16.mxu0 %v756_v25  ;;  %v867_v24 = vmov 920167782  }
  0x31   :  { %789 = vmatprep.subr.bf16.mxu1 %v788_v28 }
  0x33   :  { %759 = vmatpush1.bf16.msra.mxu0 %v758_v31  ;;  %v868_v31 = vmov 1326507024  }
  0x34   :  { %791 = vmatpush1.bf16.msra.mxu1 %v790_v32 }
  0x36   :  { %180 = vmatmul.mubr.f32.vlgmr.msra.gmra.mrb[0].mxu0 %v28_v33 }
  0x37   :  { %251 = vmatmul.mubr.f32.vlgmr.msra.gmra.mrb[0].mxu1 %v28_v33 }
 0x109   :  { %v181_v43 = vpop.f32.mrb[0].mxu0 }
 0x10a   :  { %v914_v44 = vadd.f32 %v181_v43, %v98_v40  ;;  %v252_v45 = vpop.f32.mrb[0].mxu1  ;;  %v183_v46 = vpop.f32.mrb[1].mxu0 }
 0x10b   :  { %v916_v47 = vadd.f32 %v252_v45, %v106_v41  ;;  %v918_v48 = vadd.f32 %v183_v46, %v102_v42  ;;  %v920_v49 = vpop.f32.mrb[1].mxu1 }
 0x10c   :  { %v257_v50 = vand.u32 2147483647, %v914_v44  ;;  %v260_v51 = vand.u32 2139095040, %v914_v44 }
 0x10d   :  { %v465_v52 = vand.u32 2147483647, %v916_v47  ;;  %v468_v53 = vand.u32 2139095040, %v916_v47  ;;  %v364_v58 = vand.u32 2139095040, %v918_v48  ;;  %v361_v11 = vand.u32 2147483647, %v918_v48 }
 0x10e   :  { %v261_v54 = vshrl.u32 %v260_v51, 23  ;;  %v264_v55 = vand.u32 8388607, %v257_v50 }
 0x10f   :  { %v469_v56 = vshrl.u32 %v468_v53, 23  ;;  %v472_v57 = vand.u32 8388607, %v465_v52  ;;  %v365_v61 = vshrl.u32 %v364_v58, 23 }
 0x110   :  { %v712_v59 = vadd.s32 4294967169, %v261_v54  ;;  %v265_v0 = vor.u32 8388608, %v264_v55 }
 0x111   :  { %v720_v60 = vadd.s32 4294967169, %v469_v56  ;;  %v473_v1 = vor.u32 8388608, %v472_v57  ;;  %v716_v3 = vadd.s32 4294967169, %v365_v61 }
 0x112   :  { %v267_v62 = vadd.s32 1, %v712_v59  ;;  %v934_v9 = vshll.u32 %v265_v0, 8 }
 0x113   :  { %v475_v2 = vadd.s32 1, %v720_v60  ;;  %v936_v10 = vshll.u32 %v473_v1, 8  ;;  %v939_v12 = vadd.s32 1, %v716_v3 }
 0x114   :  { %vm268_vm0 = vcmp.gt.s32.totalorder %v267_v62, 0 }
 0x115   :  { %v269_v4 = vsel %vm268_vm0, %v267_v62, 0  ;;  %vm476_vm1 = vcmp.gt.s32.totalorder %v475_v2, 0  ;;  %vm372_vm6 = vcmp.gt.s32.totalorder %v939_v12, 0 }
 0x116   :  { %v270_v5 = vshrl.u32 %v269_v4, 5  ;;  %v271_v6 = vand.u32 31, %v269_v4  ;;  %v477_v7 = vsel %vm476_vm1, %v475_v2, 0 }
 0x117   :  { %v942_v16 = vshrl.u32 %v477_v7, 5  ;;  %v479_v17 = vand.u32 31, %v477_v7 }
 0x118   :  { %v272_v13 = vsub.s32 32, %v271_v6  ;;  %v274_v15 = vshll.u32 %v863_v14, %v271_v6  ;;  %v277_v19 = vshll.u32 %v864_v18, %v271_v6  ;;  %v280_v21 = vshll.u32 %v865_v20, %v271_v6 }
 0x119   :  { %v283_v23 = vshll.u32 %v866_v22, %v271_v6  ;;  %v286_v25 = vshll.u32 %v867_v24, %v271_v6  ;;  %vm289_vm2 = vcmp.lt.s32.totalorder %v270_v5, 1  ;;  %vm290_vm3 = vcmp.lt.s32.totalorder %v270_v5, 2 }
 0x11a   :  { %v275_v26 = vshrl.u32 %v864_v18, %v272_v13  ;;  %v278_v27 = vshrl.u32 %v865_v20, %v272_v13  ;;  %v281_v28 = vshrl.u32 %v866_v22, %v272_v13  ;;  %v273_v29 = vshrl.u32 %v863_v14, %v272_v13 }
 0x11b   :  { %v284_v30 = vshrl.u32 %v867_v24, %v272_v13  ;;  %v287_v32 = vshrl.u32 %v868_v31, %v272_v13  ;;  %v480_v38 = vsub.s32 32, %v479_v17  ;;  %vm291_vm4 = vcmp.lt.s32.totalorder %v270_v5, 3 }
 0x11c   :  { %v276_v33 = vor.u32 %v275_v26, %v274_v15  ;;  %v279_v36 = vor.u32 %v278_v27, %v277_v19  ;;  %v282_v37 = vor.u32 %v281_v28, %v280_v21  ;;  %vm292_vm5 = vcmp.lt.s32.totalorder %v270_v5, 4 }
 0x11d   :  { %v285_v39 = vor.u32 %v284_v30, %v283_v23  ;;  %v288_v40 = vor.u32 %v287_v32, %v286_v25  ;;  %v482_v54 = vshll.u32 %v863_v14, %v479_v17  ;;  %v483_v57 = vshrl.u32 %v864_v18, %v480_v38 }
 0x11e   :  { %v293_v41 = vsel %vm289_vm2, %v273_v29, %v276_v33  ;;  %v294_v42 = vsel %vm292_vm5, %v282_v37, 2102212464  ;;  %v297_v43 = vsel %vm289_vm2, %v276_v33, %v279_v36  ;;  %v301_v45 = vsel %vm289_vm2, %v279_v36, %v282_v37 }
 0x11f   :  { %v295_v46 = vsel %vm291_vm4, %v279_v36, %v294_v42  ;;  %v298_v51 = vsel %vm292_vm5, %v285_v39, 920167782  ;;  %v302_v53 = vsel %vm292_vm5, %v288_v40, 1326507024  ;;  %v485_v58 = vshll.u32 %v864_v18, %v479_v17 }
 0x120   :  { %v299_v55 = vsel %vm291_vm4, %v282_v37, %v298_v51  ;;  %v303_v56 = vsel %vm291_vm4, %v285_v39, %v302_v53  ;;  %v296_v59 = vsel %vm290_vm3, %v293_v41, %v295_v46  ;;  %v486_v62 = vshrl.u32 %v865_v20, %v480_v38 }
 0x121   :  { %v300_v60 = vsel %vm290_vm3, %v297_v43, %v299_v55  ;;  %v304_v61 = vsel %vm290_vm3, %v301_v45, %v303_v56  ;;  %v484_v3 = vor.u32 %v483_v57, %v482_v54  ;;  %v488_v6 = vshll.u32 %v865_v20, %v479_v17 }
 0x122   :  { %v966_v63 = vmul.u32.u64.low %v934_v9, %v304_v61  ;;  %v967_v0 = vmul.u32.u64.high %v934_v9, %v304_v61, %v966_v63  ;;  %v970_v1 = vmul.u32.u64.low %v934_v9, %v300_v60  ;;  %v971_v2 = vmul.u32.u64.high %v934_v9, %v300_v60, %v970_v1 }
 0x123   :  { %v487_v4 = vor.u32 %v486_v62, %v485_v58  ;;  %v489_v7 = vshrl.u32 %v866_v22, %v480_v38  ;;  %v481_v5 = vshrl.u32 %v863_v14, %v480_v38  ;;  %v491_v13 = vshll.u32 %v866_v22, %v479_v17 }
 0x124   :  { %v492_v15 = vshrl.u32 %v867_v24, %v480_v38  ;;  %v495_v19 = vshrl.u32 %v868_v31, %v480_v38  ;;  %v312_v21 = vmul.u32 %v934_v9, %v296_v59  ;;  %v494_v25 = vshll.u32 %v867_v24, %v479_v17 }
 0x125   :  { %v490_v23 = vor.u32 %v489_v7, %v488_v6  ;;  %vm497_vm7 = vcmp.lt.s32.totalorder %v942_v16, 1  ;;  %vm314_vm8 = vc.u32 %v967_v0, %v970_v1  ;;  %v315_v26 = vadd.s32 1, %v971_v2 }
 0x126   :  { %v493_v27 = vor.u32 %v492_v15, %v491_v13  ;;  %vm498_vm9 = vcmp.lt.s32.totalorder %v942_v16, 2  ;;  %v496_v28 = vor.u32 %v495_v19, %v494_v25  ;;  %vm499_vm10 = vcmp.lt.s32.totalorder %v942_v16, 3 }
 0x127   :  { %vm500_vm11 = vcmp.lt.s32.totalorder %v942_v16, 4  ;;  %v505_v29 = vsel %vm497_vm7, %v484_v3, %v487_v4  ;;  %v316_v9 = vsel %vm314_vm8, %v315_v26, %v971_v2  ;;  %v509_v32 = vsel %vm497_vm7, %v487_v4, %v490_v23 }
 0x128   :  { %v502_v30 = vsel %vm500_vm11, %v490_v23, 2102212464  ;;  %v506_v17 = vsel %vm500_vm11, %v493_v27, 920167782  ;;  %v317_v33 = vadd.s32 %v316_v9, %v312_v21  ;;  %v501_v36 = vsel %vm497_vm7, %v481_v5, %v484_v3 }
 0x129   :  { %v507_v37 = vsel %vm499_vm10, %v490_v23, %v506_v17  ;;  %v510_v38 = vsel %vm500_vm11, %v496_v28, 1326507024  ;;  %v503_v39 = vsel %vm499_vm10, %v487_v4, %v502_v30  ;;  %v373_v42 = vsel %vm372_vm6, %v939_v12, 0 }
 0x12a   :  { %v508_v40 = vsel %vm498_vm9, %v505_v29, %v507_v37  ;;  %v511_v41 = vsel %vm499_vm10, %v493_v27, %v510_v38  ;;  %v318_v43 = vadd.s32 536870912, %v317_v33  ;;  %v1008_v55 = vadd.f32 %v920_v49, %v932_v8 }
 0x12b   :  { %v512_v45 = vsel %vm498_vm9, %v509_v32, %v511_v41  ;;  %v998_v46 = vmul.u32.u64.low %v936_v10, %v508_v40  ;;  %v999_v51 = vmul.u32.u64.high %v936_v10, %v508_v40, %v998_v46  ;;  %v504_v12 = vsel %vm498_vm9, %v501_v36, %v503_v39 }
 0x12c   :  { %v1003_v53 = vmul.u32.u64.low %v936_v10, %v512_v45  ;;  %v1004_v54 = vmul.u32.u64.high %v936_v10, %v512_v45, %v1003_v53  ;;  %v1010_v56 = vshrl.u32 %v318_v43, 30  ;;  %v375_v57 = vand.u32 31, %v373_v42 }
 0x12d   :  { %v523_v59 = vadd.s32 1, %v999_v51  ;;  %v368_v60 = vand.u32 8388607, %v361_v11  ;;  %v520_v62 = vmul.u32 %v936_v10, %v504_v12  ;;  %v572_v49 = vand.u32 2139095040, %v1008_v55 }
 0x12e   :  { %v320_v58 = vshll.u32 %v1010_v56, 30  ;;  %v376_v61 = vsub.s32 32, %v375_v57  ;;  %vm522_vm12 = vc.u32 %v1004_v54, %v998_v46  ;;  %v374_v13 = vshrl.u32 %v373_v42, 5 }
 0x12f   :  { %v524_v16 = vsel %vm522_vm12, %v523_v59, %v999_v51  ;;  %v369_v4 = vor.u32 8388608, %v368_v60  ;;  %v378_v10 = vshll.u32 %v863_v14, %v375_v57  ;;  %v573_v15 = vshrl.u32 %v572_v49, 23 }
 0x130   :  { %v321_v8 = vsub.s32 %v317_v33, %v320_v58  ;;  %v525_v63 = vadd.s32 %v524_v16, %v520_v62  ;;  %v379_v2 = vshrl.u32 %v864_v18, %v376_v61  ;;  %v382_v6 = vshrl.u32 %v865_v20, %v376_v61 }
 0x131   :  { %v385_v7 = vshrl.u32 %v866_v22, %v376_v61  ;;  %v381_v21 = vshll.u32 %v864_v18, %v375_v57  ;;  %v384_v23 = vshll.u32 %v865_v20, %v375_v57  ;;  %v388_v25 = vshrl.u32 %v867_v24, %v376_v61 }
 0x132   :  { %v323_v3 = vsub.s32 0, %v321_v8  ;;  %v526_v5 = vadd.s32 536870912, %v525_v63  ;;  %v380_v27 = vor.u32 %v379_v2, %v378_v10  ;;  %v387_v28 = vshll.u32 %v866_v22, %v375_v57 }
 0x133   :  { %v391_v29 = vshrl.u32 %v868_v31, %v376_v61  ;;  %v383_v30 = vor.u32 %v382_v6, %v381_v21  ;;  %v386_v17 = vor.u32 %v385_v7, %v384_v23  ;;  %v390_v32 = vshll.u32 %v867_v24, %v375_v57 }
 0x134   :  { %v713_v19 = vmin.u32 %v323_v3, %v321_v8  ;;  %v1030_v26 = vshrl.u32 %v526_v5, 30  ;;  %v389_v36 = vor.u32 %v388_v25, %v387_v28  ;;  %v409_v37 = vshll.u32 %v369_v4, 8 }
 0x135   :  { %v313_v38 = vadd.s32 %v970_v1, %v967_v0  ;;  %v392_v40 = vor.u32 %v391_v29, %v390_v32  ;;  %vm396_vm13 = vcmp.lt.s32.totalorder %v374_v13, 4  ;;  %vm393_vm14 = vcmp.lt.s32.totalorder %v374_v13, 1 }
 0x136   :  { %v325_v9 = vclz %v713_v19  ;;  %v528_v33 = vshll.u32 %v1030_v26, 30  ;;  %vm395_vm15 = vcmp.lt.s32.totalorder %v374_v13, 3  ;;  %v402_v42 = vsel %vm396_vm13, %v389_v36, 920167782 }
 0x137   :  { %v401_v43 = vsel %vm393_vm14, %v380_v27, %v383_v30  ;;  %v403_v45 = vsel %vm395_vm15, %v386_v17, %v402_v42  ;;  %v724_v51 = vadd.s32 4294967169, %v573_v15  ;;  %v343_v12 = vsub.s32 4, %v1010_v56 }
 0x138   :  { %v714_v39 = vadd.s32 4294967294, %v325_v9  ;;  %v1038_v41 = vsub.s32 %v525_v63, %v528_v33  ;;  %vm394_vm1 = vcmp.lt.s32.totalorder %v374_v13, 2  ;;  %v405_v0 = vsel %vm393_vm14, %v383_v30, %v386_v17 }
 0x139   :  { %v398_v58 = vsel %vm396_vm13, %v386_v17, 2102212464  ;;  %v406_v59 = vsel %vm396_vm13, %v392_v40, 1326507024  ;;  %v377_v62 = vshrl.u32 %v863_v14, %v376_v61  ;;  %v404_v49 = vsel %vm394_vm1, %v401_v43, %v403_v45 }
 0x13a   :  { %vm715_vm0 = vcmp.lt.s32.totalorder %v714_v39, 0  ;;  %v531_v60 = vsub.s32 0, %v1038_v41  ;;  %v407_v16 = vsel %vm395_vm15, %v389_v36, %v406_v59  ;;  %vm259_vm2 = vcmp.lt.s32.totalorder %v914_v44, 0 }
 0x13b   :  { %v328_v53 = vsel %vm715_vm0, 0, %v714_v39  ;;  %v408_v4 = vsel %vm394_vm1, %v405_v0, %v407_v16  ;;  %v397_v6 = vsel %vm393_vm14, %v377_v62, %v380_v27  ;;  %v399_v7 = vsel %vm395_vm15, %v383_v30, %v398_v58 }
 0x13c   :  { %v329_v1 = vsub.s32 32, %v328_v53  ;;  %v333_v57 = vsub.s32 4294967266, %v328_v53  ;;  %v330_v63 = vshll.u32 %v321_v8, %v328_v53  ;;  %v721_v61 = vmin.u32 %v531_v60, %v1038_v41 }
 0x13d   :  { %v1055_v15 = vmul.u32.u64.low %v409_v37, %v408_v4  ;;  %v1056_v19 = vmul.u32.u64.high %v409_v37, %v408_v4, %v1055_v15  ;;  %v1059_v21 = vmul.u32.u64.low %v409_v37, %v404_v49  ;;  %v1060_v23 = vmul.u32.u64.high %v409_v37, %v404_v49, %v1059_v21 }
 0x13e   :  { %v331_v2 = vshrl.u32 %v313_v38, %v329_v1  ;;  %v334_v3 = vadd.s32 127, %v333_v57  ;;  %v579_v8 = vadd.s32 1, %v724_v51  ;;  %v344_v28 = vsel %vm259_vm2, %v343_v12, %v1010_v56 }
 0x13f   :  { %v400_v27 = vsel %vm394_vm1, %v397_v6, %v399_v7  ;;  %vm1069_vm4 = vcmp.le.f32.partialorder %v257_v50, 0.7853982  ;;  %vm418_vm5 = vc.u32 %v1056_v19, %v1059_v21  ;;  %v533_v32 = vclz %v721_v61 }
 0x140   :  { %v332_v5 = vor.u32 %v331_v2, %v330_v63  ;;  %v335_v10 = vshll.u32 %v334_v3, 23  ;;  %vm580_vm3 = vcmp.gt.s32.totalorder %v579_v8, 0  ;;  %v346_v17 = vsel %vm1069_vm4, 0, %v344_v28 }
 0x141   :  { %v419_v56 = vadd.s32 1, %v1060_v23  ;;  %v416_v33 = vmul.u32 %v409_v37, %v400_v27  ;;  %v581_v36 = vsel %vm580_vm3, %v579_v8, 0  ;;  %v569_v50 = vand.u32 2147483647, %v1008_v55 }
 0x142   :  { %v336_v25 = vor.u32 4788187, %v335_v10  ;;  %v339_v30 = vcvt.s32.f32 %v332_v5  ;;  %v350_v40 = vadd.s32 3, %v346_v17  ;;  %v583_v43 = vand.u32 31, %v581_v36 }
 0x143   :  { %v420_v38 = vsel %vm418_vm5, %v419_v56, %v1060_v23  ;;  %v722_v45 = vadd.s32 4294967294, %v533_v32  ;;  %v576_v57 = vand.u32 8388607, %v569_v50  ;;  %v582_v62 = vshrl.u32 %v581_v36, 5 }
 0x144   :  { %v337_v9 = vand.u32 2147483647, %v336_v25  ;;  %v421_v42 = vadd.s32 %v420_v38, %v416_v33  ;;  %v584_v12 = vsub.s32 32, %v583_v43  ;;  %v351_v37 = vand.u32 3, %v350_v40 }
 0x145   :  { %vm723_vm6 = vcmp.lt.s32.totalorder %v722_v45, 0  ;;  %v592_v49 = vshll.u32 %v865_v20, %v583_v43  ;;  %v586_v63 = vshll.u32 %v863_v14, %v583_v43  ;;  %v589_v2 = vshll.u32 %v864_v18, %v583_v43 }
 0x146   :  { %v340_v13 = vmul.f32 %v339_v30, %v337_v9  ;;  %v422_v53 = vadd.s32 536870912, %v421_v42  ;;  %v587_v58 = vshrl.u32 %v864_v18, %v584_v12  ;;  %v590_v59 = vshrl.u32 %v865_v20, %v584_v12 }
 0x147   :  { %v593_v16 = vshrl.u32 %v866_v22, %v584_v12  ;;  %v595_v3 = vshll.u32 %v866_v22, %v583_v43  ;;  %v596_v4 = vshrl.u32 %v867_v24, %v584_v12  ;;  %v577_v7 = vor.u32 8388608, %v576_v57 }
 0x148   :  { %v341_v39 = vxor.u32 2147483648, %v340_v13  ;;  %v1085_v1 = vshrl.u32 %v422_v53, 30  ;;  %v588_v10 = vor.u32 %v587_v58, %v586_v63  ;;  %v591_v15 = vor.u32 %v590_v59, %v589_v2 }
 0x149   :  { %v594_v5 = vor.u32 %v593_v16, %v592_v49  ;;  %v597_v61 = vor.u32 %v596_v4, %v595_v3  ;;  %v599_v23 = vshrl.u32 %v868_v31, %v584_v12  ;;  %v1102_v20 = vsel %vm723_vm6, 0, %v722_v45 }
 0x14a   :  { %v342_v51 = vsel %vm259_vm2, %v341_v39, %v340_v13  ;;  %v424_v60 = vshll.u32 %v1085_v1, 30  ;;  %v598_v18 = vshll.u32 %v867_v24, %v583_v43  ;;  %vm349_vm7 = vweird.f32 %v914_v44 }
 0x14b   :  { %v345_v0 = vsel %vm1069_vm4, %v914_v44, %v342_v51  ;;  %vm353_vm8 = vcmp.eq.s32.totalorder %v351_v37, 0  ;;  %vm356_vm9 = vcmp.eq.s32.totalorder %v351_v37, 2  ;;  %vm601_vm10 = vcmp.lt.s32.totalorder %v582_v62, 1 }
 0x14c   :  { %819 = vcosq.f32 %v345_v0  ;;  %v1098_v6 = vsub.s32 %v421_v42, %v424_v60  ;;  %vm604_vm11 = vcmp.lt.s32.totalorder %v582_v62, 4  ;;  %v585_v25 = vshrl.u32 %v863_v14, %v584_v12 }
 0x14d   :  { %821 = vsinq.f32 %v345_v0  ;;  %v600_v28 = vor.u32 %v599_v23, %v598_v18  ;;  %v606_v31 = vsel %vm604_vm11, %v594_v5, 2102212464  ;;  %v541_v27 = vsub.s32 4294967266, %v1102_v20 }
 0x14e   :  { %v427_v8 = vsub.s32 0, %v1098_v6  ;;  %v609_v29 = vsel %vm601_vm10, %v588_v10, %v591_v15  ;;  %v610_v9 = vsel %vm604_vm11, %v597_v61, 920167782  ;;  %v617_v24 = vshll.u32 %v577_v7, 8 }
 0x14f   :  { %vm602_vm12 = vcmp.lt.s32.totalorder %v582_v62, 2  ;;  %vm603_vm13 = vcmp.lt.s32.totalorder %v582_v62, 3  ;;  %v605_v32 = vsel %vm601_vm10, %v585_v25, %v588_v10  ;;  %v613_v36 = vsel %vm601_vm10, %v591_v15, %v594_v5 }
 0x150   :  { %v717_v22 = vmin.u32 %v427_v8, %v1098_v6  ;;  %v607_v33 = vsel %vm603_vm13, %v591_v15, %v606_v31  ;;  %v611_v14 = vsel %vm603_vm13, %v594_v5, %v610_v9  ;;  %v614_v42 = vsel %vm604_vm11, %v600_v28, 1326507024 }
 0x151   :  { %v612_v40 = vsel %vm602_vm12, %v609_v29, %v611_v14  ;;  %v615_v45 = vsel %vm603_vm13, %v597_v61, %v614_v42  ;;  %vm352_vm14 = vcmp.lt.s32.totalorder %v351_v37, 2  ;;  %v608_v2 = vsel %vm602_vm12, %v605_v32, %v607_v33 }
 0x152   :  { %v429_v17 = vclz %v717_v22  ;;  %v1118_v51 = vmul.u32.u64.low %v617_v24, %v612_v40  ;;  %v1119_v53 = vmul.u32.u64.high %v617_v24, %v612_v40, %v1118_v51  ;;  %v616_v0 = vsel %vm602_vm12, %v613_v36, %v615_v45 }
 0x153   :  { %v1123_v59 = vmul.u32.u64.low %v617_v24, %v616_v0  ;;  %v1124_v60 = vmul.u32.u64.high %v617_v24, %v616_v0, %v1123_v59  ;;  %v542_v3 = vadd.s32 127, %v541_v27  ;;  %v417_v37 = vadd.s32 %v1059_v21, %v1056_v19 }
 0x154   :  { %v718_v39 = vadd.s32 4294967294, %v429_v17  ;;  %v627_v4 = vadd.s32 1, %v1119_v53  ;;  %v537_v5 = vsub.s32 32, %v1102_v20  ;;  %v624_v15 = vmul.u32 %v617_v24, %v608_v2 }
 0x155   :  { %vm626_vm0 = vc.u32 %v1124_v60, %v1118_v51  ;;  %v521_v62 = vadd.s32 %v998_v46, %v1004_v54  ;;  %v543_v23 = vshll.u32 %v542_v3, 23  ;;  %v538_v28 = vshll.u32 %v1038_v41, %v1102_v20 }
 0x156   :  { %v820_v30 = vpop.eup %819  ;;  %vm719_vm15 = vcmp.lt.s32.totalorder %v718_v39, 0  ;;  %v628_v61 = vsel %vm626_vm0, %v627_v4, %v1119_v53  ;;  %vm363_vm1 = vcmp.lt.s32.totalorder %v918_v48, 0  ;;  %vm1147_vm2 = vcmp.le.f32.partialorder %v361_v11, 0.7853982 }
 0x157   :  { %v822_v56 = vpop.eup %821  ;;  %v357_v13 = vxor.u32 2147483648, %v820_v30  ;;  %v432_v58 = vsel %vm719_vm15, 0, %v718_v39  ;;  %v629_v18 = vadd.s32 %v628_v61, %v624_v15  ;;  %v539_v21 = vshrl.u32 %v521_v62, %v537_v5 }
 0x158   :  { %v354_v38 = vxor.u32 2147483648, %v822_v56  ;;  %v433_v16 = vsub.s32 32, %v432_v58  ;;  %v437_v63 = vsub.s32 4294967266, %v432_v58  ;;  %v434_v8 = vshll.u32 %v1098_v6, %v432_v58 }
 0x159   :  { %v358_v43 = vsel %vm356_vm9, %v357_v13, %v822_v56  ;;  %v630_v25 = vadd.s32 536870912, %v629_v18  ;;  %v544_v31 = vor.u32 4788187, %v543_v23  ;;  %v540_v9 = vor.u32 %v539_v21, %v538_v28 }
 0x15a   :  { %v355_v12 = vsel %vm353_vm8, %v820_v30, %v354_v38  ;;  %v438_v7 = vadd.s32 127, %v437_v63  ;;  %v435_v10 = vshrl.u32 %v417_v37, %v433_v16  ;;  %vm467_vm4 = vcmp.lt.s32.totalorder %v916_v47, 0 }
 0x15b   :  { %v359_v57 = vsel %vm352_vm14, %v355_v12, %v358_v43  ;;  %v631_v29 = vshrl.u32 %v630_v25, 30  ;;  %v545_v17 = vand.u32 2147483647, %v544_v31  ;;  %v547_v54 = vcvt.s32.f32 %v540_v9 }
 0x15c   :  { %v1128_v49 = vsel %vm349_vm7, nan, %v359_v57  ;;  %v439_v44 = vshll.u32 %v438_v7, 23  ;;  %v436_v22 = vor.u32 %v435_v10, %v434_v8  ;;  %v625_v43 = vadd.s32 %v1118_v51, %v1124_v60 }
 0x15d   :  { %v632_v30 = vshll.u32 %v631_v29, 30  ;;  %v548_v6 = vmul.f32 %v547_v54, %v545_v17  ;;  %vm1160_vm5 = vcmp.le.f32.partialorder %v465_v52, 0.7853982  ;;  %v447_v12 = vsub.s32 4, %v1085_v1 }
 0x15e   :  { %v440_v19 = vor.u32 4788187, %v439_v44  ;;  %v443_v24 = vcvt.s32.f32 %v436_v22  ;;  %v551_v16 = vsub.s32 4, %v1030_v26  ;;  %v655_v5 = vsub.s32 4, %v631_v29 }
 0x15f   :  { %v633_v46 = vsub.s32 %v629_v18, %v632_v30  ;;  %v549_v36 = vxor.u32 2147483648, %v548_v6  ;;  %v448_v52 = vsel %vm363_vm1, %v447_v12, %v1085_v1  ;;  %vm571_vm6 = vcmp.lt.s32.totalorder %v1008_v55, 0 }
 0x160   :  { %v441_v27 = vand.u32 2147483647, %v440_v19  ;;  %v450_v2 = vsel %vm1147_vm2, 0, %v448_v52  ;;  %v552_v4 = vsel %vm467_vm4, %v551_v16, %v1030_v26  ;;  %vm1182_vm7 = vcmp.le.f32.partialorder %v569_v50, 0.7853982 }
 0x161   :  { %v635_v56 = vsub.s32 0, %v633_v46  ;;  %v550_v42 = vsel %vm467_vm4, %v549_v36, %v548_v6  ;;  %v454_v10 = vadd.s32 3, %v450_v2  ;;  %v554_v44 = vsel %vm1160_vm5, 0, %v552_v4 }
 0x162   :  { %v444_v32 = vmul.f32 %v443_v24, %v441_v27  ;;  %v553_v59 = vsel %vm1160_vm5, %v916_v47, %v550_v42  ;;  %v656_v8 = vsel %vm571_vm6, %v655_v5, %v631_v29  ;;  %v558_v26 = vadd.s32 3, %v554_v44 }
 0x163   :  { %v725_v33 = vmin.u32 %v635_v56, %v633_v46  ;;  %v455_v18 = vand.u32 3, %v454_v10  ;;  %v658_v31 = vsel %vm1182_vm7, 0, %v656_v8  ;;  %v869_v50 = vmov 1966171168  }
 0x164   :  { %v445_v13 = vxor.u32 2147483648, %v444_v32  ;;  %v680_v27 = vunpack.c.l.s4 %v869_v50  ;;  %v559_v9 = vand.u32 3, %v558_v26  ;;  %vm453_vm13 = vweird.f32 %v918_v48 }
 0x165   :  { %v637_v14 = vclz %v725_v33  ;;  %vm457_vm8 = vcmp.eq.s32.totalorder %v455_v18, 0  ;;  %vm460_vm9 = vcmp.eq.s32.totalorder %v455_v18, 2  ;;  %vm456_vm10 = vcmp.lt.s32.totalorder %v455_v18, 2 }
 0x166   :  { %v446_v41 = vsel %vm363_vm1, %v445_v13, %v444_v32  ;;  %v662_v32 = vadd.s32 3, %v658_v31  ;;  %vm561_vm11 = vcmp.eq.s32.totalorder %v559_v9, 0  ;;  %vm564_vm12 = vcmp.eq.s32.totalorder %v559_v9, 2 }
 0x167   :  { %v726_v20 = vadd.s32 4294967294, %v637_v14  ;;  %v449_v39 = vsel %vm1147_vm2, %v918_v48, %v446_v41  ;;  %v681_v6 = vunpack.c.0.s8 %v680_v27  ;;  %vm560_vm14 = vcmp.lt.s32.totalorder %v559_v9, 2 }
 0x168   :  { %823 = vcosq.f32 %v449_v39  ;;  %v663_v13 = vand.u32 3, %v662_v32  ;;  %vm557_vm0 = vweird.f32 %v916_v47  ;;  %vm704_vm4 = vcmp.lt.s32.totalorder %v95_v34, 512 }
 0x169   :  { %vm727_vm3 = vcmp.lt.s32.totalorder %v726_v20, 0  ;;  %825 = vsinq.f32 %v449_v39  ;;  %v684_v38 = vsub.s32 %v681_v6, %v906_v35 }
 0x16a   :  { %v640_v40 = vsel %vm727_vm3, 0, %v726_v20  ;;  %827 = vcosq.f32 %v553_v59  ;;  %vm668_vm15 = vcmp.eq.s32.totalorder %v663_v13, 2  ;;  %vm665_vm1 = vcmp.eq.s32.totalorder %v663_v13, 0 }
 0x16b   :  { %v641_v45 = vsub.s32 32, %v640_v40  ;;  %v645_v53 = vsub.s32 4294967266, %v640_v40  ;;  %v642_v0 = vshll.u32 %v633_v46, %v640_v40  ;;  %829 = vsinq.f32 %v553_v59 }
 0x16c   :  { %vm664_vm2 = vcmp.lt.s32.totalorder %v663_v13, 2  ;;  %vm661_vm3 = vweird.f32 %v1008_v55 }
 0x16d   :  { %v643_v57 = vshrl.u32 %v625_v43, %v641_v45  ;;  %v646_v58 = vadd.s32 127, %v645_v53 }
 0x16f   :  { %v644_v51 = vor.u32 %v643_v57, %v642_v0  ;;  %v647_v60 = vshll.u32 %v646_v58, 23 }
 0x171   :  { %v648_v63 = vor.u32 4788187, %v647_v60  ;;  %v651_v37 = vcvt.s32.f32 %v644_v51 }
 0x172   :  { %v824_v15 = vpop.eup %823 }
 0x173   :  { %v649_v3 = vand.u32 2147483647, %v648_v63  ;;  %v826_v61 = vpop.eup %825  ;;  %v461_v25 = vxor.u32 2147483648, %v824_v15 }
 0x174   :  { %v828_v21 = vpop.eup %827  ;;  %v458_v22 = vxor.u32 2147483648, %v826_v61 }
 0x175   :  { %v652_v7 = vmul.f32 %v651_v37, %v649_v3  ;;  %v830_v28 = vpop.eup %829  ;;  %v565_v24 = vxor.u32 2147483648, %v828_v21  ;;  %v462_v17 = vsel %vm460_vm9, %v461_v25, %v826_v61 }
 0x176   :  { %v562_v29 = vxor.u32 2147483648, %v830_v28  ;;  %v459_v30 = vsel %vm457_vm8, %v824_v15, %v458_v22 }
 0x177   :  { %v653_v1 = vxor.u32 2147483648, %v652_v7  ;;  %v463_v46 = vsel %vm456_vm10, %v459_v30, %v462_v17  ;;  %v566_v56 = vsel %vm564_vm12, %v565_v24, %v830_v28 }
 0x178   :  { %v563_v54 = vsel %vm561_vm11, %v828_v21, %v562_v29  ;;  %v464_v14 = vsel %vm453_vm13, nan, %v463_v46 }
 0x179   :  { %v654_v23 = vsel %vm571_vm6, %v653_v1, %v652_v7  ;;  %v567_v41 = vsel %vm560_vm14, %v563_v54, %v566_v56  ;;  %v677_v40 = vcombine.low %v1128_v49, %v464_v14 }
 0x17a   :  { %v657_v19 = vsel %vm1182_vm7, %v1008_v55, %v654_v23  ;;  %v568_v43 = vsel %vm557_vm0, nan, %v567_v41 }
 0x17b   :  { %831 = vcosq.f32 %v657_v19  ;;  %v685_v11 = vrot.slane %v677_v40, %v684_v38 }
 0x17c   :  { %833 = vsinq.f32 %v657_v19 }
 0x185   :  { %v832_v33 = vpop.eup %831 }
 0x186   :  { %v834_v36 = vpop.eup %833  ;;  %v669_v20 = vxor.u32 2147483648, %v832_v33 }
 0x187   :  { %v666_v39 = vxor.u32 2147483648, %v834_v36 }
 0x188   :  { %v670_v42 = vsel %vm668_vm15, %v669_v20, %v834_v36 }
 0x189   :  { %v667_v45 = vsel %vm665_vm1, %v832_v33, %v666_v39 }
 0x18a   :  { %v671_v48 = vsel %vm664_vm2, %v667_v45, %v670_v42 }
 0x18b   :  { %v672_v53 = vsel %vm661_vm3, nan, %v671_v48 }
 0x18c   :  { %v678_v12 = vcombine.low %v568_v43, %v672_v53 }
 0x18e   :  { %v692_v0 = vrot.slane %v678_v12, %v684_v38 }
 0x190   :  { %v693_v57 = vcombine.low %v685_v11, %v692_v0 }
 0x192   :  { %v700_v35 = vrot.slane %v693_v57, %v684_v38 }
 0x194   :  { %706 = vst.msk [vmem:[%s1203_s3] sm:$0xf] %vm704_vm4, %v700_v35 }
 0x195   :  { %711 = vsyncpa [#allocation3], 1 }

</bundles_post_ra>
